<compile_context>
chip_gen: v5e
topology: v5e:2x2
jax: 0.10.0
libtpu: 0.0.40
codegen_flags: <defaults>
</compile_context>

<pallas_src>
import functools

import jax
import jax.numpy as jnp
from jax.experimental import pallas as pl
from jax.experimental.pallas import tpu as pltpu

BN_EPS = 1e-5
_HW_FULL_TILE_CAP = 2048   # up to this size, one lane tile = full HW (no masking)
_HW_TILE = 1024            # lane tile for large HW (multiple of 128)
_ROW_TILE_CAP = 512


def _round_up(x, m):
    return ((x + m - 1) // m) * m


# ---------------- Phase 1: per-row spatial sum (pooling pass) ----------------
def _pool_sum_kernel(x_ref, sum_ref, *, hw, hw_tile, ragged):
    # grid = (row_tiles, hw_tiles); hw axis (innermost) is the reduction axis.
    k = pl.program_id(1)

    @pl.when(k == 0)
    def _():
        sum_ref[...] = jnp.zeros_like(sum_ref)

    xv = x_ref[...].astype(jnp.float32)          # native-dtype stream, f32 accum
    if ragged:
        # Mask lanes past HW on the ragged last hw tile (OOB reads are garbage).
        lane = jax.lax.broadcasted_iota(jnp.int32, xv.shape, dimension=1)
        xv = jnp.where(lane < (hw - k * hw_tile), xv, 0.0)
    sum_ref[...] += jnp.sum(xv, axis=-1, keepdims=True)


# ---------------- Phase 2: broadcast multiply (scale pass) -------------------
def _scale_kernel(x_ref, s_ref, o_ref):
    # x_ref: (row_tile, hw_tile) in x's dtype; s_ref: (row_tile, 1) f32 gate.
    o_ref[...] = (x_ref[...].astype(jnp.float32) * s_ref[...]).astype(o_ref.dtype)


def cam_forward(x_nchw, params):
    """CAM forward pass. x_nchw: (B, C, H, W); params: dict of fc/bn weights."""
    B, C, H, W = x_nchw.shape
    HW = H * W
    R = B * C
    x2 = x_nchw.reshape(R, HW)                   # contiguous view, no copy

    # ---------------- tile plan ----------------
    if HW <= _HW_FULL_TILE_CAP:
        hw_tile = HW                             # full last dim (no 128 requirement)
    else:
        hw_tile = _HW_TILE                       # 128-multiple; ragged tail masked
    n_hw = pl.cdiv(HW, hw_tile)
    hw_ragged = (HW % hw_tile) != 0

    if R <= 8:
        row_tile = R                             # full second-minor dim
    else:
        # >= 2 row tiles whenever possible so v7x can shard the parallel
        # row axis across both TensorCores.
        row_tile = max(8, min(_ROW_TILE_CAP, _round_up(pl.cdiv(R, 2), 8)))
    n_row = pl.cdiv(R, row_tile)

    itemsize = jnp.dtype(x_nchw.dtype).itemsize
    tile_bytes = row_tile * hw_tile * itemsize
    # Phase 2 double-buffers input and output tiles (~4x tile) plus slack;
    # cap at 32 MiB so the plan stays safe on v7x (64 MiB physical VMEM),
    # and set it explicitly so large tiles aren't throttled by v5e's 16 MiB
    # scoped default.
    vmem_budget = int(min(32 * 1024 * 1024, max(8 * 1024 * 1024, 6 * tile_bytes)))

    # ---------------- phase 1: per-row spatial sums, exact (R, 1) -----------
    sums = pl.pallas_call(
        functools.partial(_pool_sum_kernel, hw=HW, hw_tile=hw_tile,
                          ragged=hw_ragged),
        out_shape=jax.ShapeDtypeStruct((R, 1), jnp.float32),
        grid=(n_row, n_hw),
        in_specs=[pl.BlockSpec((row_tile, hw_tile), lambda i, k: (i, k))],
        out_specs=pl.BlockSpec((row_tile, 1), lambda i, k: (i, 0)),
        compiler_params=pltpu.CompilerParams(
            dimension_semantics=("parallel", "arbitrary"),
            vmem_limit_bytes=vmem_budget,
        ),
        # NOTE(v7x): add pipeline_mode=pl.Buffered(3) on the x BlockSpec if
        # profiling shows exposed DMA latency.
    )(x2)

    # ---------------- gate: tiny, fused by XLA (off the streaming hot path) --
    w1 = params["w1"].astype(jnp.float32)        # (M, C)
    b1 = params["b1"].astype(jnp.float32)        # (M,)
    gamma = params["gamma"].astype(jnp.float32)  # (M,)
    beta = params["beta"].astype(jnp.float32)    # (M,)
    w2 = params["w2"].astype(jnp.float32)        # (C, M)
    b2 = params["b2"].astype(jnp.float32)        # (C,)

    pooled = sums.reshape(B, C) * (1.0 / HW)     # exact mean (true HW divisor)
    # fc1: contract against w1's axis 1 -> no transposed weight copy in HBM.
    y = jax.lax.dot_general(pooled, w1, (((1,), (1,)), ((), ())),
                            preferred_element_type=jnp.float32) + b1[None, :]
    # BatchNorm1d, training-mode statistics over the full batch (biased var).
    mu = jnp.mean(y, axis=0, keepdims=True)
    var = jnp.mean(jnp.square(y - mu), axis=0, keepdims=True)
    y = (y - mu) * jax.lax.rsqrt(var + BN_EPS) * gamma[None, :] + beta[None, :]
    y = jnp.maximum(y, 0.0)
    # fc2 + sigmoid
    z = jax.lax.dot_general(y, w2, (((1,), (1,)), ((), ())),
                            preferred_element_type=jnp.float32) + b2[None, :]
    gate_col = jax.nn.sigmoid(z).reshape(R, 1)   # f32 per-row gate column

    # ---------------- phase 2: out = x * gate (streaming), exact (R, HW) ----
    # (If x were dead downstream, input_output_aliases={0: 0} would also drop
    #  the extra full-size output allocation; not used here since x is reused.)
    out = pl.pallas_call(
        _scale_kernel,
        out_shape=jax.ShapeDtypeStruct((R, HW), x_nchw.dtype),
        grid=(n_row, n_hw),
        in_specs=[
            pl.BlockSpec((row_tile, hw_tile), lambda i, j: (i, j)),
            pl.BlockSpec((row_tile, 1), lambda i, j: (i, 0)),
        ],
        out_specs=pl.BlockSpec((row_tile, hw_tile), lambda i, j: (i, j)),
        compiler_params=pltpu.CompilerParams(
            dimension_semantics=("parallel", "parallel"),
            vmem_limit_bytes=vmem_budget,
        ),
    )(x2, gate_col)

    return out.reshape(B, C, H, W)


def cam_reference(x_nchw, params):
    """Plain-JAX reference matching PyTorch CAM.forward in training mode."""
    x32 = x_nchw.astype(jnp.float32)
    pooled = jnp.mean(x32, axis=(2, 3))                       # (B, C)
    y = pooled @ params["w1"].T + params["b1"]                # (B, M)
    mu = jnp.mean(y, axis=0, keepdims=True)
    var = jnp.mean((y - mu) ** 2, axis=0, keepdims=True)
    y = (y - mu) / jnp.sqrt(var + BN_EPS) * params["gamma"] + params["beta"]
    y = jnp.maximum(y, 0.0)
    z = y @ params["w2"].T + params["b2"]                     # (B, C)
    s = jax.nn.sigmoid(z)
    return (x32 * s[:, :, None, None]).astype(x_nchw.dtype)


def init_params(key, in_channels, med_channels):
    k1, k2, k3, k4 = jax.random.split(key, 4)
    # Deterministic synthetic init (not a checkpoint load).
    w1 = 0.1 * jax.random.normal(k1, (med_channels, in_channels), jnp.float32)
    b1 = 0.05 * jax.random.normal(k2, (med_channels,), jnp.float32)
    w2 = 0.1 * jax.random.normal(k3, (in_channels, med_channels), jnp.float32)
    b2 = 0.05 * jax.random.normal(k4, (in_channels,), jnp.float32)
    gamma = jnp.ones((med_channels,), jnp.float32)
    beta = jnp.zeros((med_channels,), jnp.float32)
    return dict(w1=w1, b1=b1, w2=w2, b2=b2, gamma=gamma, beta=beta)


if __name__ == "__main__":
    B, C, H, W = 2, 4, 16, 16
    MED = 8

    key = jax.random.PRNGKey(0)
    kx, kp = jax.random.split(key)
    x = jax.random.normal(kx, (B, C, H, W), jnp.float32)
    params = init_params(kp, C, MED)

    out = jax.jit(cam_forward)(x, params)
    out = jax.block_until_ready(out)

    ref = cam_reference(x, params)
    assert out.shape == (B, C, H, W)
    assert out.dtype == x.dtype
    assert jnp.allclose(out, ref, atol=1e-5, rtol=1e-5), "mismatch vs reference"

    # TODO(synk): BatchNorm1d running_mean/running_var buffer updates (a
    # training-time side effect, not part of the forward output) are not
    # emitted; forward matches PyTorch training-mode behavior only.

    print("KERNEL_OK")
</pallas_src>

<mosaic_0001>
module attributes {stable_mosaic.version = 11 : i64} {
  func.func @_pool_sum_kernel(%arg0: i32, %arg1: i32, %arg2: memref<8x256xf32, #tpu.memory_space<vmem>>, %arg3: memref<8x1xf32, #tpu.memory_space<vmem>>) attributes {dimension_semantics = [#tpu.dimension_semantics<parallel>, #tpu.dimension_semantics<arbitrary>], iteration_bounds = array<i64: 1, 1>, scalar_prefetch = 0 : i64, scratch_operands = 0 : i64, tpu.core_type = #tpu.core_type<tc>, window_params = [{transform_indices = @transform_0, window_bounds = array<i64: 8, 256>}, {transform_indices = @transform_1, window_bounds = array<i64: 8, 1>}]} {
    %c0_i32 = arith.constant 0 : i32
    %0 = arith.cmpi eq, %arg1, %c0_i32 : i32
    %1 = arith.extui %0 : i1 to i32
    %c0_i32_0 = arith.constant 0 : i32
    %2 = arith.cmpi ne, %1, %c0_i32_0 : i32
    scf.if %2 {
      %cst_6 = arith.constant 0.000000e+00 : f32
      %9 = vector.broadcast %cst_6 : f32 to vector<8x1xf32>
      %c0_7 = arith.constant 0 : index
      %c0_8 = arith.constant 0 : index
      %10 = vector.load %arg3[%c0_7, %c0_8] : memref<8x1xf32, #tpu.memory_space<vmem>>, vector<8x1xf32>
      tpu.vector_store %arg3[%c0_7, %c0_8], %9 {strides = array<i32>} : memref<8x1xf32, #tpu.memory_space<vmem>>, vector<8x1xf32>,
    } else {
    }
    %c0 = arith.constant 0 : index
    %c0_1 = arith.constant 0 : index
    %3 = vector.load %arg2[%c0, %c0_1] : memref<8x256xf32, #tpu.memory_space<vmem>>, vector<8x256xf32>
    %c0_2 = arith.constant 0 : index
    %c0_3 = arith.constant 0 : index
    %4 = vector.load %arg3[%c0_2, %c0_3] : memref<8x1xf32, #tpu.memory_space<vmem>>, vector<8x1xf32>
    %cst = arith.constant dense<0.000000e+00> : vector<8xf32>
    %5 = vector.multi_reduction <add>, %3, %cst [1] : vector<8x256xf32> to vector<8xf32>
    %6 = vector.shape_cast %5 : vector<8xf32> to vector<8x1xf32>
    %7 = arith.addf %4, %6 : vector<8x1xf32>
    %c0_4 = arith.constant 0 : index
    %c0_5 = arith.constant 0 : index
    %8 = vector.load %arg3[%c0_4, %c0_5] : memref<8x1xf32, #tpu.memory_space<vmem>>, vector<8x1xf32>
    tpu.vector_store %arg3[%c0_4, %c0_5], %7 {strides = array<i32>} : memref<8x1xf32, #tpu.memory_space<vmem>>, vector<8x1xf32>,
    return
  }
  func.func @transform_0(%arg0: i32, %arg1: i32) -> (i32, i32) {
    %c0_i32 = arith.constant 0 : i32
    return %arg0, %arg1 : i32, i32
  }
  func.func @transform_1(%arg0: i32, %arg1: i32) -> (i32, i32) {
    %c0_i32 = arith.constant 0 : i32
    %c0_i32_0 = arith.constant 0 : i32
    return %arg0, %c0_i32 : i32, i32
  }
}

module attributes {stable_mosaic.version = 11 : i64} {
  func.func @_scale_kernel(%arg0: i32, %arg1: i32, %arg2: memref<8x256xf32, #tpu.memory_space<vmem>>, %arg3: memref<8x1xf32, #tpu.memory_space<vmem>>, %arg4: memref<8x256xf32, #tpu.memory_space<vmem>>) attributes {dimension_semantics = [#tpu.dimension_semantics<parallel>, #tpu.dimension_semantics<parallel>], iteration_bounds = array<i64: 1, 1>, scalar_prefetch = 0 : i64, scratch_operands = 0 : i64, tpu.core_type = #tpu.core_type<tc>, window_params = [{transform_indices = @transform_0, window_bounds = array<i64: 8, 256>}, {transform_indices = @transform_1, window_bounds = array<i64: 8, 1>}, {transform_indices = @transform_2, window_bounds = array<i64: 8, 256>}]} {
    %c0 = arith.constant 0 : index
    %c0_0 = arith.constant 0 : index
    %0 = vector.load %arg2[%c0, %c0_0] : memref<8x256xf32, #tpu.memory_space<vmem>>, vector<8x256xf32>
    %c0_1 = arith.constant 0 : index
    %c0_2 = arith.constant 0 : index
    %1 = vector.load %arg3[%c0_1, %c0_2] : memref<8x1xf32, #tpu.memory_space<vmem>>, vector<8x1xf32>
    %2 = vector.broadcast %1 : vector<8x1xf32> to vector<8x256xf32>
    %3 = arith.mulf %0, %2 : vector<8x256xf32>
    %c0_3 = arith.constant 0 : index
    %c0_4 = arith.constant 0 : index
    %4 = vector.load %arg4[%c0_3, %c0_4] : memref<8x256xf32, #tpu.memory_space<vmem>>, vector<8x256xf32>
    tpu.vector_store %arg4[%c0_3, %c0_4], %3 {strides = array<i32>} : memref<8x256xf32, #tpu.memory_space<vmem>>, vector<8x256xf32>,
    return
  }
  func.func @transform_0(%arg0: i32, %arg1: i32) -> (i32, i32) {
    %c0_i32 = arith.constant 0 : i32
    return %arg0, %arg1 : i32, i32
  }
  func.func @transform_1(%arg0: i32, %arg1: i32) -> (i32, i32) {
    %c0_i32 = arith.constant 0 : i32
    %c0_i32_0 = arith.constant 0 : i32
    return %arg0, %c0_i32 : i32, i32
  }
  func.func @transform_2(%arg0: i32, %arg1: i32) -> (i32, i32) {
    %c0_i32 = arith.constant 0 : i32
    return %arg0, %arg1 : i32, i32
  }
}

</mosaic_0001>

<bundles_post_ra>
// kernel: cam_forward.2
= control target key start
LH: loop header
LB: loop body
LE: loop exit
PB: predicated region body
PF: predicated region fallthrough
CT: control target
= control target key end

     0   :  { %vm12_vm0 = vcmask 7168   ;;  %v28_v2 = vmov 0.0   ;;  %s54_s0 = inlined_call_operand.vmem [shape: f32[8,256], index: 0, kind: input, shape index: {}]   ;;  %s55_s1 = inlined_call_operand.vmem [shape: f32[8,1], index: 1, kind: output, shape index: {}]  }
   0x1   :  { %v14_v0 = vld [vmem:[%s54_s0] sm:$0xff]  ;;  %v15_v1 = vld [vmem:[%s54_s0 + $0x8] sm:$0xff]  ;;  %13 = vst.msk [vmem:[%s55_s1] sm:$0xff] %vm12_vm0, %v28_v2 }
   0x2   :  { %v17_v3 = vadd.f32 %v15_v1, %v14_v0 }
   0x4   :  { %18 = vadd.xlane.f32.xlu0 %v17_v3 }
   0x8   :  { %v16_v4 = vld [vmem:[%s55_s1] sm:$0xff] }
  0x77   :  { %v19_v5 = vpop.xlane.xlu0 %18 }
  0x78   :  { %v20_v6 = vadd.f32 %v19_v5, %v16_v4 }
  0x7a   :  { %22 = vst.msk [vmem:[%s55_s1] sm:$0xff] %vm12_vm0, %v20_v6 }

// kernel: cam_forward.3
= control target key start
LH: loop header
LB: loop body
LE: loop exit
PB: predicated region body
PF: predicated region fallthrough
CT: control target
= control target key end

     0   :  { %v29_v0 = vmov 0   ;;  %s60_s1 = inlined_call_operand.vmem [shape: f32[8,1], index: 1, kind: input, shape index: {}]   ;;  %s61_s0 = inlined_call_operand.vmem [shape: f32[8,256], index: 0, kind: input, shape index: {}]   ;;  %s62_s2 = inlined_call_operand.vmem [shape: f32[8,256], index: 2, kind: output, shape index: {}]  }
   0x1   :  { %28 = vset.pattern.permute.xlu0 %v29_v0  ;;  %v13_v1 = vld [vmem:[%s60_s1] sm:$0xff]  ;;  %v12_v3 = vld [vmem:[%s61_s0 + $0x8] sm:$0xff] }
   0x2   :  { %16 = vperm.xlu0 %28, %v13_v1   ;;  %v11_v2 = vld [vmem:[%s61_s0] sm:$0xff] }
  0x74   :  { %v17_v4 = vpop.permute.xlu0 %16 }
  0x75   :  { %v19_v5 = vmul.f32 %v17_v4, %v11_v2  ;;  %v20_v6 = vmul.f32 %v17_v4, %v12_v3 }
  0x77   :  { %21 = vst [vmem:[%s62_s2] sm:$0xff] %v19_v5 }
  0x78   :  { %22 = vst [vmem:[%s62_s2 + $0x8] sm:$0xff] %v20_v6 }

</bundles_post_ra>
